<compile_context>
chip_gen: v7x
topology: tpu7x:2x2x1
jax: 0.10.0
libtpu: 0.0.40
codegen_flags: <defaults>
</compile_context>

<pallas_src>
import jax
import jax.numpy as jnp
from jax.experimental import pallas as pl
from jax.experimental.pallas import tpu as pltpu


def model_kernel(x_ref, p_ref, o_ref):
    # x_ref: (tm, 2) f32
    # p_ref: (3, 12) f32 = [tile3(W_fold row0); tile3(W_fold row1); tile3(b_fold)]
    # o_ref: (tm, 12) f32
    x = x_ref[...]                                   # (tm, 2)
    p = p_ref[...]                                   # (3, 12)
    # VPU broadcast multiply-adds (K = 2): no MXU, no concatenate, one store.
    o_ref[...] = x[:, 0:1] * p[0:1, :] + x[:, 1:2] * p[1:2, :] + p[2:3, :]


def fold_params(params):
    """One-time host-side algebraic fold (exact up to f32 summation order).

    cat((h,h,h)) @ W2 == h @ (W2[0:4] + W2[4:8] + W2[8:12]) = h @ W2s
      W_fold = W1 @ W2s @ W3                  (2, 4)
      b_fold = b1 @ W2s @ W3 + b2 @ W3 + b3   (1, 4)
    The output cat((h3,h3,h3)) is absorbed by lane-tiling each row 3x -> (3,12).
    """
    w1, b1, w2, b2, w3, b3 = params
    w2s = w2[0:4] + w2[4:8] + w2[8:12]               # (4, 4)
    w_fold = w1 @ w2s @ w3                           # (2, 4)
    b_fold = b1 @ w2s @ w3 + b2 @ w3 + b3            # (1, 4)
    p4 = jnp.concatenate([w_fold, b_fold], axis=0)   # (3, 4)
    p_packed = jnp.tile(p4, (1, 3)).astype(jnp.float32)   # (3, 12) lane-replicated
    return p_packed


def model_forward(x, p_packed, *, tm=512):
    """Forward pass. `p_packed` is the (3,12) buffer from fold_params()."""
    N = x.shape[0]
    out_shape = jax.ShapeDtypeStruct((N, 12), jnp.float32)
    cost = pl.CostEstimate(
        flops=4 * N * 12,
        transcendentals=0,
        bytes_accessed=(N * 2 + 3 * 12 + N * 12) * 4,
    )

    if N >= tm and N % tm == 0:
        # Scale-up path: mem-bound, tile the batch and let Mosaic shard the
        # parallel axis across TensorCores (v7x has 2 TCs).
        return pl.pallas_call(
            model_kernel,
            out_shape=out_shape,
            grid=(N // tm,),
            in_specs=[
                pl.BlockSpec((tm, 2), lambda i: (i, 0)),
                pl.BlockSpec((3, 12), lambda i: (0, 0)),
            ],
            out_specs=pl.BlockSpec((tm, 12), lambda i: (i, 0)),
            compiler_params=pltpu.CompilerParams(
                dimension_semantics=("parallel",)),
            cost_estimate=cost,
        )(x, p_packed)

    # Small-N path (the spec's N=2): whole problem is one VMEM block.
    vmem = pl.BlockSpec(memory_space=pltpu.MemorySpace.VMEM)
    return pl.pallas_call(
        model_kernel,
        out_shape=out_shape,
        in_specs=[vmem, vmem],
        out_specs=vmem,
        cost_estimate=cost,
    )(x, p_packed)


def reference_forward(x, params):
    # Unfused reference mirroring the (adapted) original op sequence.
    w1, b1, w2, b2, w3, b3 = params
    h1 = x @ w1 + b1
    c1 = jnp.concatenate([h1, h1, h1], axis=1)
    h2 = c1 @ w2 + b2
    h3 = h2 @ w3 + b3
    return jnp.concatenate([h3, h3, h3], axis=1)


def init_params(key):
    # Deterministic synthetic parameters (shapes follow the adapted linears).
    k1, k2, k3, k4, k5, k6 = jax.random.split(key, 6)
    w1 = jax.random.normal(k1, (2, 4), jnp.float32) * 0.5   # layers  (2 -> 4)
    b1 = jax.random.normal(k2, (1, 4), jnp.float32) * 0.1
    w2 = jax.random.normal(k3, (12, 4), jnp.float32) * 0.5  # layers2 (12 -> 4)
    b2 = jax.random.normal(k4, (1, 4), jnp.float32) * 0.1
    w3 = jax.random.normal(k5, (4, 4), jnp.float32) * 0.5   # layers, 2nd use (4 -> 4)
    b3 = jax.random.normal(k6, (1, 4), jnp.float32) * 0.1
    return (w1, b1, w2, b2, w3, b3)


if __name__ == "__main__":
    key = jax.random.PRNGKey(0)
    kx, kp = jax.random.split(key)
    x = jax.random.normal(kx, (2, 2), jnp.float32)   # matches `torch.randn(2, 2)`
    params = init_params(kp)

    # One-time fold (would be cached alongside the params in a real model).
    p_packed = jax.block_until_ready(fold_params(params))

    out = jax.block_until_ready(model_forward(x, p_packed))

    ref = reference_forward(x, params)
    assert out.shape == (2, 12)
    assert jnp.allclose(out, ref, atol=1e-5, rtol=1e-5), "mismatch vs JAX reference"

    print("KERNEL_OK")
</pallas_src>

<mosaic_0001>
module attributes {stable_mosaic.version = 11 : i64} {
  func.func @model_kernel(%arg0: memref<2x2xf32, #tpu.memory_space<vmem>>, %arg1: memref<3x12xf32, #tpu.memory_space<vmem>>, %arg2: memref<2x12xf32, #tpu.memory_space<vmem>>) attributes {dimension_semantics = [], scalar_prefetch = 0 : i64, scratch_operands = 0 : i64, tpu.core_type = #tpu.core_type<tc>} {
    %c0 = arith.constant 0 : index
    %c0_0 = arith.constant 0 : index
    %0 = vector.load %arg0[%c0, %c0_0] : memref<2x2xf32, #tpu.memory_space<vmem>>, vector<2x2xf32>
    %c0_1 = arith.constant 0 : index
    %c0_2 = arith.constant 0 : index
    %1 = vector.load %arg1[%c0_1, %c0_2] : memref<3x12xf32, #tpu.memory_space<vmem>>, vector<3x12xf32>
    %2 = vector.extract_strided_slice %0 {offsets = [0, 0], sizes = [2, 1], strides = [1, 1]} : vector<2x2xf32> to vector<2x1xf32>
    %3 = vector.extract_strided_slice %1 {offsets = [0, 0], sizes = [1, 12], strides = [1, 1]} : vector<3x12xf32> to vector<1x12xf32>
    %4 = vector.broadcast %2 : vector<2x1xf32> to vector<2x12xf32>
    %5 = vector.broadcast %3 : vector<1x12xf32> to vector<2x12xf32>
    %6 = arith.mulf %4, %5 : vector<2x12xf32>
    %7 = vector.extract_strided_slice %0 {offsets = [0, 1], sizes = [2, 1], strides = [1, 1]} : vector<2x2xf32> to vector<2x1xf32>
    %8 = vector.extract_strided_slice %1 {offsets = [1, 0], sizes = [1, 12], strides = [1, 1]} : vector<3x12xf32> to vector<1x12xf32>
    %9 = vector.broadcast %7 : vector<2x1xf32> to vector<2x12xf32>
    %10 = vector.broadcast %8 : vector<1x12xf32> to vector<2x12xf32>
    %11 = arith.mulf %9, %10 : vector<2x12xf32>
    %12 = arith.addf %6, %11 : vector<2x12xf32>
    %13 = vector.extract_strided_slice %1 {offsets = [2, 0], sizes = [1, 12], strides = [1, 1]} : vector<3x12xf32> to vector<1x12xf32>
    %14 = vector.broadcast %13 : vector<1x12xf32> to vector<2x12xf32>
    %15 = arith.addf %12, %14 : vector<2x12xf32>
    %c0_3 = arith.constant 0 : index
    %c0_4 = arith.constant 0 : index
    %16 = vector.load %arg2[%c0_3, %c0_4] : memref<2x12xf32, #tpu.memory_space<vmem>>, vector<2x12xf32>
    tpu.vector_store %arg2[%c0_3, %c0_4], %15 {strides = array<i32>} : memref<2x12xf32, #tpu.memory_space<vmem>>, vector<2x12xf32>,
    return
  }
}

</mosaic_0001>

<bundles_post_ra>
// kernel: tpu_custom_call.1
= control target key start
LH: loop header
LB: loop body
LE: loop exit
PB: predicated region body
PF: predicated region fallthrough
CT: control target
= control target key end

     0   :  { %7 = vsyncpa [#allocation3], 0  ;;  %s216_s0 = inlined_call_operand.hbm [shape: f32[2,2], index: 0, kind: input, shape index: {}]   ;;  %s217_s1 = inlined_call_operand.hbm [shape: f32[3,12], index: 1, kind: input, shape index: {}]   ;;  %s218_s2 = inlined_call_operand.hbm [shape: f32[2,12], index: 2, kind: output, shape index: {}]  }
   0x1   :  { %8 = vsyncpa [#allocation6], 0 }
   0x2   :  { %9 = vsyncpa [#allocation4], 0  ;;  %s160_s9 = smov [#allocation2]   ;;  %s161_s11 = smov [#allocation5]  }
   0x3   :  { %s16_s10 = sshll.u32 %s160_s9, 4  ;;  %s26_s12 = sshll.u32 %s161_s11, 4  ;;  %s17_s10 = int_to_ptr.vmem [resolvable:$true] %s16_s10  ;;  %s27_s12 = int_to_ptr.vmem [resolvable:$true] %s26_s12 }
   0x4   :  { %s88_s15 = scalar_lea.hbm %s216_s0, 32 }
   0x5   :  { %p89_p0 = scmp.ne.s32.totalorder %s216_s0, %s88_s15  ;;  %p92_p1 = scmp.lt.u32.totalorder %s88_s15, %s216_s0 }
   0x7   :  { %p94_p2 = pnand %p92_p1, %p89_p0 }
   0x9   :  { %97 = shalt.err (!%p94_p2)
}
   0xa   :  { %s98_s20 = scalar_lea.vmem %s17_s10, 32  ;;  %p103_p4 = scmp.lt.s32.totalorder %s17_s10, %s17_s10 }
   0xb   :  { %p99_p3 = scmp.ne.s32.totalorder %s17_s10, %s98_s20  ;;  %p104_p5 = scmp.lt.s32.totalorder %s98_s20, %s98_s20 }
   0xd   :  { %p105_p6 = por %p104_p5, %p103_p4 }
   0xf   :  { %p106_p7 = pnand %p105_p6, %p99_p3 }
  0x11   :  { %109 = shalt.err (!%p106_p7)
}
  0x12   :  { %19 = dma.hbm_to_vmem [thread:$0]  %s216_s0, 32, %s17_s10, [#allocation3]  }
  0x13   :  { %s110_s25 = scalar_lea.hbm %s217_s1, 64 }
  0x14   :  { %p111_p8 = scmp.ne.s32.totalorder %s217_s1, %s110_s25  ;;  %p114_p9 = scmp.lt.u32.totalorder %s110_s25, %s217_s1 }
  0x16   :  { %p116_p10 = pnand %p114_p9, %p111_p8 }
  0x18   :  { %119 = shalt.err (!%p116_p10)
}
  0x19   :  { %s120_s30 = scalar_lea.vmem %s27_s12, 64  ;;  %p125_p12 = scmp.lt.s32.totalorder %s27_s12, %s27_s12 }
  0x1a   :  { %p121_p11 = scmp.ne.s32.totalorder %s27_s12, %s120_s30  ;;  %p126_p13 = scmp.lt.s32.totalorder %s120_s30, %s120_s30 }
  0x1c   :  { %p127_p0 = por %p126_p13, %p125_p12 }
  0x1e   :  { %p128_p1 = pnand %p127_p0, %p121_p11 }
  0x20   :  { %131 = shalt.err (!%p128_p1)
}
  0x21   :  { %29 = dma.hbm_to_vmem [thread:$0]  %s217_s1, 64, %s27_s12, [#allocation6]  }
  0x22   :  { %154 = dma.done.wait [#allocation3], 32  }
  0x23   :  { %155 = vsyncadd [#allocation3], 4294967264 }
  0x24   :  { %156 = dma.done.wait [#allocation6], 64  }
  0x25   :  { %157 = vsyncadd [#allocation6], 4294967232  ;;  %v162_v0 = vmov 0   ;;  %v36_v1 = vld [vmem:[#allocation2] sm:$0x3]  ;;  %v163_v2 = vmov 1   ;;  %v43_v3 = vlaneseq }
  0x26   :  { %86 = vset.pattern.permute.xlu0 %v162_v0  ;;  %v37_v7 = vld [vmem:[#allocation5] sm:$0x7]  ;;  %s164_s1 = smov [#allocation7]   ;;  %vm63_vm0 = vcmask 91136  }
  0x27   :  { %40 = vperm.xlu0 %86, %v36_v1   ;;  %v44_v4 = vshrl.u32 %v43_v3, 7  ;;  %s71_s4 = sshll.u32 %s164_s1, 4  ;;  %s72_s4 = int_to_ptr.vmem [resolvable:$true] %s71_s4 }
  0x28   :  { %s132_s5 = scalar_lea.vmem %s72_s4, 32  ;;  %p137_p3 = scmp.lt.s32.totalorder %s72_s4, %s72_s4 }
  0x29   :  { %v45_v5 = vsub.s32 0, %v44_v4  ;;  %v54_v6 = vsub.s32 1, %v44_v4  ;;  %v60_v11 = vsub.s32 2, %v44_v4  ;;  %p133_p2 = scmp.ne.s32.totalorder %s72_s4, %s132_s5  ;;  %p138_p4 = scmp.lt.s32.totalorder %s132_s5, %s132_s5 }
  0x2b   :  { %87 = vset.pattern.permute.xlu0 %v163_v2  ;;  %v46_v9 = vrot.slane %v37_v7, %v45_v5  ;;  %v55_v10 = vrot.slane %v37_v7, %v54_v6  ;;  %v61_v14 = vrot.slane %v37_v7, %v60_v11  ;;  %p139_p5 = por %p138_p4, %p137_p3 }
  0x2c   :  { %49 = vperm.xlu0 %87, %v36_v1  }
  0x2d   :  { %p140_p6 = pnand %p139_p5, %p133_p2 }
  0xa6   :  { %v41_v8 = vpop.permute.xlu0 %40 }
  0xa7   :  { %v47_v13 = vmul.f32 %v46_v9, %v41_v8 }
  0xab   :  { %v50_v12 = vpop.permute.xlu0 %49 }
  0xac   :  { %v56_v15 = vmul.f32 %v55_v10, %v50_v12 }
  0xae   :  { %v57_v16 = vadd.f32 %v56_v15, %v47_v13 }
  0xb0   :  { %v62_v17 = vadd.f32 %v61_v14, %v57_v16 }
  0xb2   :  { %64 = vst.msk [vmem:[#allocation7] sm:$0x3] %vm63_vm0, %v62_v17 }
  0xb3   :  { %143 = shalt.err (!%p140_p6)
}
  0xb4   :  { %s144_s8 = scalar_lea.hbm %s218_s2, 32 }
  0xb5   :  { %p145_p7 = scmp.ne.s32.totalorder %s218_s2, %s144_s8  ;;  %p148_p8 = scmp.lt.u32.totalorder %s144_s8, %s218_s2 }
  0xb7   :  { %p150_p9 = pnand %p148_p8, %p145_p7 }
  0xb9   :  { %153 = shalt.err (!%p150_p9)
}
  0xba   :  { %74 = dma.vmem_to_hbm [thread:$0]  %s72_s4, 32, %s218_s2, [#allocation4]  }
  0xbb   :  { %158 = dma.done.wait [#allocation4], 32  }
  0xbc   :  { %159 = vsyncadd [#allocation4], 4294967264 }
  0xbd   :  { %78 = vsyncpa [#allocation3], 1 }
  0xbe   :  { %79 = vsyncpa [#allocation6], 1 }
  0xbf   :  { %80 = vsyncpa [#allocation4], 1 }

</bundles_post_ra>
